<compile_context>
chip_gen: v6e
topology: v6e:2x2x1
jax: 0.10.0
libtpu: 0.0.40
codegen_flags: <defaults>
</compile_context>

<pallas_src>
import math

import jax
import jax.numpy as jnp
from jax.experimental import pallas as pl
from jax.experimental.pallas import tpu as pltpu

MAX_PERIOD = 1000.0  # SinusoidalEmbedder default


def _ogen_embed_kernel(ids_ref,    # SMEM (B*Lt,) int32 -- scalar-prefetched token ids
                       img_ref,    # (1, Li, D) f32     -- image latents (this batch elem)
                       etab_hbm,   # (V, H)  f32, HBM   -- embed_tokens table (not in VMEM)
                       wproj_ref,  # (D, H)  f32        -- image_proj weight
                       tpos_ref,   # (1, Lt, H) f32     -- text pos emb (+ timestep emb folded)
                       ipos_ref,   # (1, Li, H) f32     -- image pos emb (+ bias + timestep emb)
                       out_ref,    # (1, Lt+Li, H) f32
                       text_buf,   # VMEM (Lt, H) f32   -- gather landing buffer
                       sem):       # DMA sems (Lt,)
    b = pl.program_id(0)
    Lt = tpos_ref.shape[1]
    Li = img_ref.shape[1]

    # ---- Text path: row-gather the embed table straight from HBM. ----------
    # One small (1, H) DMA per token; all issued up-front so they overlap with
    # the image matmul below.  Lt is small and static -> unrolled Python loop.
    copies = []
    for t in range(Lt):
        rid = ids_ref[b * Lt + t]
        cp = pltpu.make_async_copy(etab_hbm.at[pl.ds(rid, 1), :],
                                   text_buf.at[pl.ds(t, 1), :],
                                   sem.at[t])
        cp.start()
        copies.append(cp)

    # ---- Image path (overlaps with the gather DMAs). ------------------------
    # image_proj Linear; bias + sine-cosine pos emb + timestep emb are already
    # folded into ipos_ref, so this is one matmul + one add.
    img = jnp.dot(img_ref[0], wproj_ref[...], preferred_element_type=jnp.float32)
    out_ref[0, Lt:Lt + Li, :] = img + ipos_ref[0]

    # ---- Finish text path: wait for gathers, add pos(+timestep) emb. --------
    for cp in copies:
        cp.wait()
    out_ref[0, 0:Lt, :] = text_buf[...] + tpos_ref[0]


def ogen_forward_embeddings(input_ids, input_images, timestep, params):
    """Returns (inputs_embeds, attention_mask) exactly as OGen.forward builds them."""
    etab = params["embed_tokens"]      # (V, H)
    wproj = params["image_proj_w"]     # (D, H)
    bproj = params["image_proj_b"]     # (1, H)
    tpos = params["text_pos"]          # (1, Lt_max, H)
    ipos = params["image_pos"]         # (1, Li_max, H)

    B, Lt = input_ids.shape
    _, Li, D = input_images.shape
    V, H = etab.shape
    assert H % 2 == 0 and H // 2 > 1, "sinusoidal embedding needs even H > 2"

    # Grid-invariant timestep embedding, computed once and folded into the
    # positional embeddings (sanctioned fold: one add per path in the kernel).
    t_emb = sinusoidal_embed_ref(jnp.asarray([timestep], dtype=jnp.int32), H)   # (1, H)
    tpos_c = tpos[:, :Lt, :] + t_emb[:, None, :]                                # (1, Lt, H)
    ipos_c = ipos[:, :Li, :] + t_emb[:, None, :] + bproj[:, None, :]            # (1, Li, H)

    ids_flat = input_ids.reshape(-1).astype(jnp.int32)                          # (B*Lt,)

    # VMEM budget from actual tile sizes (double-buffered inputs/outputs +
    # scratch, 2x headroom), capped well under v7x's 64 MiB per-core VMEM.
    tile_bytes = 4 * (Li * D + D * H + Lt * H + Li * H + (Lt + Li) * H)
    scratch_bytes = 4 * Lt * H
    vmem_limit = int(min(48 * 2**20, max(2 * (2 * tile_bytes + scratch_bytes), 4 * 2**20)))

    flops = 2 * B * Li * D * H                       # image_proj matmul
    bytes_accessed = 4 * (B * Li * D + B * Lt * H + D * H + Lt * H + Li * H
                          + B * (Lt + Li) * H) + 4 * B * Lt

    out = pl.pallas_call(
        _ogen_embed_kernel,
        out_shape=jax.ShapeDtypeStruct((B, Lt + Li, H), jnp.float32),
        grid_spec=pltpu.PrefetchScalarGridSpec(
            num_scalar_prefetch=1,
            grid=(B,),
            in_specs=[
                pl.BlockSpec((1, Li, D), lambda b, ids: (b, 0, 0)),   # image latents
                pl.BlockSpec(memory_space=pl.ANY),                    # embed table stays in HBM
                pl.BlockSpec((D, H), lambda b, ids: (0, 0)),          # image_proj weight
                pl.BlockSpec((1, Lt, H), lambda b, ids: (0, 0, 0)),   # text pos (+t_emb)
                pl.BlockSpec((1, Li, H), lambda b, ids: (0, 0, 0)),   # image pos (+bias+t_emb)
            ],
            out_specs=pl.BlockSpec((1, Lt + Li, H), lambda b, ids: (b, 0, 0)),
            scratch_shapes=[
                pltpu.VMEM((Lt, H), jnp.float32),
                pltpu.SemaphoreType.DMA((Lt,)),
            ],
        ),
        compiler_params=pltpu.CompilerParams(
            dimension_semantics=("parallel",),      # batch axis -> both TCs on v7x
            vmem_limit_bytes=vmem_limit,
        ),
        cost_estimate=pl.CostEstimate(flops=flops, transcendentals=0,
                                      bytes_accessed=bytes_accessed),
    )(ids_flat, input_images, etab, wproj, tpos_c, ipos_c)

    # Attention mask exactly as OGen.forward builds it (all-ones, (B,1,L,L)).
    # For long sequences a broadcastable (B,1,1,1) ones tensor is equivalent
    # and avoids B*L^2 HBM writes; kept dense here to match the module.
    L = Lt + Li
    attention_mask = jnp.ones((B, 1, L, L), dtype=jnp.float32)
    return out, attention_mask


# ----------------------- parameter setup / reference -------------------------

def make_image_pos(height, width, embed_dim):
    """Exact port of OGen._create_sine_cosine_positional_embeddings."""
    n = height * width
    position = jnp.arange(n, dtype=jnp.float32)[:, None]
    div_term = jnp.exp(jnp.arange(0, embed_dim, 2, dtype=jnp.float32)
                       * (-math.log(10000.0) / embed_dim))
    pe = jnp.zeros((n, embed_dim), dtype=jnp.float32)
    pe = pe.at[:, 0::2].set(jnp.sin(position * div_term))
    pe = pe.at[:, 1::2].set(jnp.cos(position * div_term))
    return pe[None]                                                       # (1, n, H)


def sinusoidal_embed_ref(timesteps, dim, max_period=MAX_PERIOD):
    half = dim // 2
    scaling = math.log(max_period) / (half - 1)
    freqs = jnp.exp(jnp.arange(half, dtype=jnp.float32) * -scaling)
    emb = timesteps[:, None].astype(jnp.float32) * freqs[None, :]
    return jnp.concatenate([jnp.sin(emb), jnp.cos(emb)], axis=-1)


def ogen_embeddings_ref(input_ids, input_images, timestep, params):
    img = input_images @ params["image_proj_w"] + params["image_proj_b"]
    img = img + params["image_pos"][:, :img.shape[1], :]
    txt = params["embed_tokens"][input_ids] + params["text_pos"][:, :input_ids.shape[1], :]
    emb = jnp.concatenate([txt, img], axis=1)
    t_tensor = jnp.full((emb.shape[0],), timestep, dtype=jnp.int32)
    t_emb = sinusoidal_embed_ref(t_tensor, emb.shape[-1])[:, None, :]
    return emb + t_emb


if __name__ == "__main__":
    B = 2
    num_patches = 4
    patch_size = 4
    text_seq_len = 8
    hidden = 128
    vocab = 64
    latent = 4 * patch_size * patch_size        # 64
    L_img = num_patches * num_patches           # 16

    key = jax.random.PRNGKey(0)
    k1, k2, k3, k4, k5, k6 = jax.random.split(key, 6)
    params = {
        "embed_tokens": jax.random.normal(k1, (vocab, hidden), jnp.float32) * 0.02,
        "image_proj_w": jax.random.normal(k2, (latent, hidden), jnp.float32)
                        * (1.0 / math.sqrt(latent)),
        "image_proj_b": jax.random.normal(k3, (1, hidden), jnp.float32) * 0.01,
        "text_pos": jax.random.normal(k4, (1, text_seq_len, hidden), jnp.float32) * 0.02,
        "image_pos": make_image_pos(num_patches, num_patches, hidden),
    }

    input_ids = jax.random.randint(k5, (B, text_seq_len), 0, vocab, dtype=jnp.int32)
    input_images = jax.random.normal(k6, (B, L_img, latent), jnp.float32)
    timestep = 37

    out, mask = ogen_forward_embeddings(input_ids, input_images, timestep, params)
    jax.block_until_ready(out)

    ref = ogen_embeddings_ref(input_ids, input_images, timestep, params)
    err = float(jnp.max(jnp.abs(out - ref)))
    assert jnp.allclose(out, ref, atol=1e-4, rtol=1e-4), f"max abs err {err}"
    assert mask.shape == (B, 1, text_seq_len + L_img, text_seq_len + L_img)

    print("KERNEL_OK")
</pallas_src>

<mosaic_0001>
module attributes {stable_mosaic.version = 11 : i64} {
  func.func @_ogen_embed_kernel(%arg0: i32, %arg1: memref<16xi32, #tpu.memory_space<smem>>, %arg2: memref<1x16x64xf32, #tpu.memory_space<vmem>>, %arg3: memref<64x128xf32, #tpu.memory_space<any>>, %arg4: memref<64x128xf32, #tpu.memory_space<vmem>>, %arg5: memref<1x8x128xf32, #tpu.memory_space<vmem>>, %arg6: memref<1x16x128xf32, #tpu.memory_space<vmem>>, %arg7: memref<1x24x128xf32, #tpu.memory_space<vmem>>, %arg8: memref<8x128xf32, #tpu.memory_space<vmem>>, %arg9: memref<8x!tpu.dma_semaphore, #tpu.memory_space<semaphore_mem>>) attributes {dimension_semantics = [#tpu.dimension_semantics<parallel>], iteration_bounds = array<i64: 2>, scalar_prefetch = 1 : i64, scratch_operands = 2 : i64, tpu.core_type = #tpu.core_type<tc>, window_params = [{transform_indices = @transform_0, window_bounds = array<i64: 1, 16, 64>}, {}, {pipeline_mode = #tpu.pipeline_mode<synchronous>, transform_indices = @transform_2, window_bounds = array<i64: 64, 128>}, {pipeline_mode = #tpu.pipeline_mode<synchronous>, transform_indices = @transform_3, window_bounds = array<i64: 1, 8, 128>}, {pipeline_mode = #tpu.pipeline_mode<synchronous>, transform_indices = @transform_4, window_bounds = array<i64: 1, 16, 128>}, {transform_indices = @transform_5, window_bounds = array<i64: 1, 24, 128>}]} {
    %c8_i32 = arith.constant 8 : i32
    %0 = arith.muli %arg0, %c8_i32 : i32
    %c0_i32 = arith.constant 0 : i32
    %1 = arith.addi %0, %c0_i32 : i32
    %2 = arith.index_cast %1 : i32 to index
    %3 = memref.load %arg1[%2] : memref<16xi32, #tpu.memory_space<smem>>
    %c0_i32_0 = arith.constant 0 : i32
    %c0_i32_1 = arith.constant 0 : i32
    %4 = tpu.memref_slice %arg3[%3, %c0_i32_1] : memref<64x128xf32, #tpu.memory_space<any>> -> memref<1x128xf32, #tpu.memory_space<any>>
    %c0_i32_2 = arith.constant 0 : i32
    %c0_i32_3 = arith.constant 0 : i32
    %5 = tpu.memref_slice %arg8[%c0_i32_2, %c0_i32_3] : memref<8x128xf32, #tpu.memory_space<vmem>> -> memref<1x128xf32, #tpu.memory_space<vmem>>
    %6 = tpu.memref_slice %arg9[%c0_i32_0] : memref<8x!tpu.dma_semaphore, #tpu.memory_space<semaphore_mem>> -> memref<1x!tpu.dma_semaphore, #tpu.memory_space<semaphore_mem>>
    %7 = tpu.memref_squeeze %6 : memref<1x!tpu.dma_semaphore, #tpu.memory_space<semaphore_mem>> -> memref<!tpu.dma_semaphore, #tpu.memory_space<semaphore_mem>>
    tpu.enqueue_dma source(%4 : memref<1x128xf32, #tpu.memory_space<any>>) target(%5 : memref<1x128xf32, #tpu.memory_space<vmem>>) target_semaphore(%7 : memref<!tpu.dma_semaphore, #tpu.memory_space<semaphore_mem>>)
    %c8_i32_4 = arith.constant 8 : i32
    %8 = arith.muli %arg0, %c8_i32_4 : i32
    %c1_i32 = arith.constant 1 : i32
    %9 = arith.addi %8, %c1_i32 : i32
    %10 = arith.index_cast %9 : i32 to index
    %11 = memref.load %arg1[%10] : memref<16xi32, #tpu.memory_space<smem>>
    %c1_i32_5 = arith.constant 1 : i32
    %c0_i32_6 = arith.constant 0 : i32
    %12 = tpu.memref_slice %arg3[%11, %c0_i32_6] : memref<64x128xf32, #tpu.memory_space<any>> -> memref<1x128xf32, #tpu.memory_space<any>>
    %c1_i32_7 = arith.constant 1 : i32
    %c0_i32_8 = arith.constant 0 : i32
    %13 = tpu.memref_slice %arg8[%c1_i32_7, %c0_i32_8] : memref<8x128xf32, #tpu.memory_space<vmem>> -> memref<1x128xf32, #tpu.memory_space<vmem>>
    %14 = tpu.memref_slice %arg9[%c1_i32_5] : memref<8x!tpu.dma_semaphore, #tpu.memory_space<semaphore_mem>> -> memref<1x!tpu.dma_semaphore, #tpu.memory_space<semaphore_mem>>
    %15 = tpu.memref_squeeze %14 : memref<1x!tpu.dma_semaphore, #tpu.memory_space<semaphore_mem>> -> memref<!tpu.dma_semaphore, #tpu.memory_space<semaphore_mem>>
    tpu.enqueue_dma source(%12 : memref<1x128xf32, #tpu.memory_space<any>>) target(%13 : memref<1x128xf32, #tpu.memory_space<vmem>>) target_semaphore(%15 : memref<!tpu.dma_semaphore, #tpu.memory_space<semaphore_mem>>)
    %c8_i32_9 = arith.constant 8 : i32
    %16 = arith.muli %arg0, %c8_i32_9 : i32
    %c2_i32 = arith.constant 2 : i32
    %17 = arith.addi %16, %c2_i32 : i32
    %18 = arith.index_cast %17 : i32 to index
    %19 = memref.load %arg1[%18] : memref<16xi32, #tpu.memory_space<smem>>
    %c2_i32_10 = arith.constant 2 : i32
    %c0_i32_11 = arith.constant 0 : i32
    %20 = tpu.memref_slice %arg3[%19, %c0_i32_11] : memref<64x128xf32, #tpu.memory_space<any>> -> memref<1x128xf32, #tpu.memory_space<any>>
    %c2_i32_12 = arith.constant 2 : i32
    %c0_i32_13 = arith.constant 0 : i32
    %21 = tpu.memref_slice %arg8[%c2_i32_12, %c0_i32_13] : memref<8x128xf32, #tpu.memory_space<vmem>> -> memref<1x128xf32, #tpu.memory_space<vmem>>
    %22 = tpu.memref_slice %arg9[%c2_i32_10] : memref<8x!tpu.dma_semaphore, #tpu.memory_space<semaphore_mem>> -> memref<1x!tpu.dma_semaphore, #tpu.memory_space<semaphore_mem>>
    %23 = tpu.memref_squeeze %22 : memref<1x!tpu.dma_semaphore, #tpu.memory_space<semaphore_mem>> -> memref<!tpu.dma_semaphore, #tpu.memory_space<semaphore_mem>>
    tpu.enqueue_dma source(%20 : memref<1x128xf32, #tpu.memory_space<any>>) target(%21 : memref<1x128xf32, #tpu.memory_space<vmem>>) target_semaphore(%23 : memref<!tpu.dma_semaphore, #tpu.memory_space<semaphore_mem>>)
    %c8_i32_14 = arith.constant 8 : i32
    %24 = arith.muli %arg0, %c8_i32_14 : i32
    %c3_i32 = arith.constant 3 : i32
    %25 = arith.addi %24, %c3_i32 : i32
    %26 = arith.index_cast %25 : i32 to index
    %27 = memref.load %arg1[%26] : memref<16xi32, #tpu.memory_space<smem>>
    %c3_i32_15 = arith.constant 3 : i32
    %c0_i32_16 = arith.constant 0 : i32
    %28 = tpu.memref_slice %arg3[%27, %c0_i32_16] : memref<64x128xf32, #tpu.memory_space<any>> -> memref<1x128xf32, #tpu.memory_space<any>>
    %c3_i32_17 = arith.constant 3 : i32
    %c0_i32_18 = arith.constant 0 : i32
    %29 = tpu.memref_slice %arg8[%c3_i32_17, %c0_i32_18] : memref<8x128xf32, #tpu.memory_space<vmem>> -> memref<1x128xf32, #tpu.memory_space<vmem>>
    %30 = tpu.memref_slice %arg9[%c3_i32_15] : memref<8x!tpu.dma_semaphore, #tpu.memory_space<semaphore_mem>> -> memref<1x!tpu.dma_semaphore, #tpu.memory_space<semaphore_mem>>
    %31 = tpu.memref_squeeze %30 : memref<1x!tpu.dma_semaphore, #tpu.memory_space<semaphore_mem>> -> memref<!tpu.dma_semaphore, #tpu.memory_space<semaphore_mem>>
    tpu.enqueue_dma source(%28 : memref<1x128xf32, #tpu.memory_space<any>>) target(%29 : memref<1x128xf32, #tpu.memory_space<vmem>>) target_semaphore(%31 : memref<!tpu.dma_semaphore, #tpu.memory_space<semaphore_mem>>)
    %c8_i32_19 = arith.constant 8 : i32
    %32 = arith.muli %arg0, %c8_i32_19 : i32
    %c4_i32 = arith.constant 4 : i32
    %33 = arith.addi %32, %c4_i32 : i32
    %34 = arith.index_cast %33 : i32 to index
    %35 = memref.load %arg1[%34] : memref<16xi32, #tpu.memory_space<smem>>
    %c4_i32_20 = arith.constant 4 : i32
    %c0_i32_21 = arith.constant 0 : i32
    %36 = tpu.memref_slice %arg3[%35, %c0_i32_21] : memref<64x128xf32, #tpu.memory_space<any>> -> memref<1x128xf32, #tpu.memory_space<any>>
    %c4_i32_22 = arith.constant 4 : i32
    %c0_i32_23 = arith.constant 0 : i32
    %37 = tpu.memref_slice %arg8[%c4_i32_22, %c0_i32_23] : memref<8x128xf32, #tpu.memory_space<vmem>> -> memref<1x128xf32, #tpu.memory_space<vmem>>
    %38 = tpu.memref_slice %arg9[%c4_i32_20] : memref<8x!tpu.dma_semaphore, #tpu.memory_space<semaphore_mem>> -> memref<1x!tpu.dma_semaphore, #tpu.memory_space<semaphore_mem>>
    %39 = tpu.memref_squeeze %38 : memref<1x!tpu.dma_semaphore, #tpu.memory_space<semaphore_mem>> -> memref<!tpu.dma_semaphore, #tpu.memory_space<semaphore_mem>>
    tpu.enqueue_dma source(%36 : memref<1x128xf32, #tpu.memory_space<any>>) target(%37 : memref<1x128xf32, #tpu.memory_space<vmem>>) target_semaphore(%39 : memref<!tpu.dma_semaphore, #tpu.memory_space<semaphore_mem>>)
    %c8_i32_24 = arith.constant 8 : i32
    %40 = arith.muli %arg0, %c8_i32_24 : i32
    %c5_i32 = arith.constant 5 : i32
    %41 = arith.addi %40, %c5_i32 : i32
    %42 = arith.index_cast %41 : i32 to index
    %43 = memref.load %arg1[%42] : memref<16xi32, #tpu.memory_space<smem>>
    %c5_i32_25 = arith.constant 5 : i32
    %c0_i32_26 = arith.constant 0 : i32
    %44 = tpu.memref_slice %arg3[%43, %c0_i32_26] : memref<64x128xf32, #tpu.memory_space<any>> -> memref<1x128xf32, #tpu.memory_space<any>>
    %c5_i32_27 = arith.constant 5 : i32
    %c0_i32_28 = arith.constant 0 : i32
    %45 = tpu.memref_slice %arg8[%c5_i32_27, %c0_i32_28] : memref<8x128xf32, #tpu.memory_space<vmem>> -> memref<1x128xf32, #tpu.memory_space<vmem>>
    %46 = tpu.memref_slice %arg9[%c5_i32_25] : memref<8x!tpu.dma_semaphore, #tpu.memory_space<semaphore_mem>> -> memref<1x!tpu.dma_semaphore, #tpu.memory_space<semaphore_mem>>
    %47 = tpu.memref_squeeze %46 : memref<1x!tpu.dma_semaphore, #tpu.memory_space<semaphore_mem>> -> memref<!tpu.dma_semaphore, #tpu.memory_space<semaphore_mem>>
    tpu.enqueue_dma source(%44 : memref<1x128xf32, #tpu.memory_space<any>>) target(%45 : memref<1x128xf32, #tpu.memory_space<vmem>>) target_semaphore(%47 : memref<!tpu.dma_semaphore, #tpu.memory_space<semaphore_mem>>)
    %c8_i32_29 = arith.constant 8 : i32
    %48 = arith.muli %arg0, %c8_i32_29 : i32
    %c6_i32 = arith.constant 6 : i32
    %49 = arith.addi %48, %c6_i32 : i32
    %50 = arith.index_cast %49 : i32 to index
    %51 = memref.load %arg1[%50] : memref<16xi32, #tpu.memory_space<smem>>
    %c6_i32_30 = arith.constant 6 : i32
    %c0_i32_31 = arith.constant 0 : i32
    %52 = tpu.memref_slice %arg3[%51, %c0_i32_31] : memref<64x128xf32, #tpu.memory_space<any>> -> memref<1x128xf32, #tpu.memory_space<any>>
    %c6_i32_32 = arith.constant 6 : i32
    %c0_i32_33 = arith.constant 0 : i32
    %53 = tpu.memref_slice %arg8[%c6_i32_32, %c0_i32_33] : memref<8x128xf32, #tpu.memory_space<vmem>> -> memref<1x128xf32, #tpu.memory_space<vmem>>
    %54 = tpu.memref_slice %arg9[%c6_i32_30] : memref<8x!tpu.dma_semaphore, #tpu.memory_space<semaphore_mem>> -> memref<1x!tpu.dma_semaphore, #tpu.memory_space<semaphore_mem>>
    %55 = tpu.memref_squeeze %54 : memref<1x!tpu.dma_semaphore, #tpu.memory_space<semaphore_mem>> -> memref<!tpu.dma_semaphore, #tpu.memory_space<semaphore_mem>>
    tpu.enqueue_dma source(%52 : memref<1x128xf32, #tpu.memory_space<any>>) target(%53 : memref<1x128xf32, #tpu.memory_space<vmem>>) target_semaphore(%55 : memref<!tpu.dma_semaphore, #tpu.memory_space<semaphore_mem>>)
    %c8_i32_34 = arith.constant 8 : i32
    %56 = arith.muli %arg0, %c8_i32_34 : i32
    %c7_i32 = arith.constant 7 : i32
    %57 = arith.addi %56, %c7_i32 : i32
    %58 = arith.index_cast %57 : i32 to index
    %59 = memref.load %arg1[%58] : memref<16xi32, #tpu.memory_space<smem>>
    %c7_i32_35 = arith.constant 7 : i32
    %c0_i32_36 = arith.constant 0 : i32
    %60 = tpu.memref_slice %arg3[%59, %c0_i32_36] : memref<64x128xf32, #tpu.memory_space<any>> -> memref<1x128xf32, #tpu.memory_space<any>>
    %c7_i32_37 = arith.constant 7 : i32
    %c0_i32_38 = arith.constant 0 : i32
    %61 = tpu.memref_slice %arg8[%c7_i32_37, %c0_i32_38] : memref<8x128xf32, #tpu.memory_space<vmem>> -> memref<1x128xf32, #tpu.memory_space<vmem>>
    %62 = tpu.memref_slice %arg9[%c7_i32_35] : memref<8x!tpu.dma_semaphore, #tpu.memory_space<semaphore_mem>> -> memref<1x!tpu.dma_semaphore, #tpu.memory_space<semaphore_mem>>
    %63 = tpu.memref_squeeze %62 : memref<1x!tpu.dma_semaphore, #tpu.memory_space<semaphore_mem>> -> memref<!tpu.dma_semaphore, #tpu.memory_space<semaphore_mem>>
    tpu.enqueue_dma source(%60 : memref<1x128xf32, #tpu.memory_space<any>>) target(%61 : memref<1x128xf32, #tpu.memory_space<vmem>>) target_semaphore(%63 : memref<!tpu.dma_semaphore, #tpu.memory_space<semaphore_mem>>)
    %c0 = arith.constant 0 : index
    %c0_39 = arith.constant 0 : index
    %c0_40 = arith.constant 0 : index
    %64 = vector.load %arg2[%c0, %c0_39, %c0_40] : memref<1x16x64xf32, #tpu.memory_space<vmem>>, vector<1x16x64xf32>
    %65 = vector.shape_cast %64 : vector<1x16x64xf32> to vector<16x64xf32>
    %c0_41 = arith.constant 0 : index
    %c0_42 = arith.constant 0 : index
    %66 = vector.load %arg4[%c0_41, %c0_42] : memref<64x128xf32, #tpu.memory_space<vmem>>, vector<64x128xf32>
    %cst = arith.constant dense<0.000000e+00> : vector<16x128xf32>
    %67 = tpu.matmul %65, %66, %cst {dimension_numbers = #tpu.dot_dimension_numbers<[1], [0], [0], [1], [0, 0, 1, 1], [], []>} : vector<16x64xf32>, vector<64x128xf32>, vector<16x128xf32> -> vector<16x128xf32>
    %c0_43 = arith.constant 0 : index
    %c0_44 = arith.constant 0 : index
    %c0_45 = arith.constant 0 : index
    %68 = vector.load %arg6[%c0_43, %c0_44, %c0_45] : memref<1x16x128xf32, #tpu.memory_space<vmem>>, vector<1x16x128xf32>
    %69 = vector.shape_cast %68 : vector<1x16x128xf32> to vector<16x128xf32>
    %70 = arith.addf %67, %69 : vector<16x128xf32>
    %c0_46 = arith.constant 0 : index
    %c8 = arith.constant 8 : index
    %c0_47 = arith.constant 0 : index
    %71 = vector.load %arg7[%c0_46, %c8, %c0_47] : memref<1x24x128xf32, #tpu.memory_space<vmem>>, vector<1x16x128xf32>
    %72 = vector.shape_cast %71 : vector<1x16x128xf32> to vector<16x128xf32>
    %73 = vector.shape_cast %70 : vector<16x128xf32> to vector<1x16x128xf32>
    tpu.vector_store %arg7[%c0_46, %c8, %c0_47], %73 {strides = array<i32>} : memref<1x24x128xf32, #tpu.memory_space<vmem>>, vector<1x16x128xf32>,
    %c0_i32_48 = arith.constant 0 : i32
    %c0_i32_49 = arith.constant 0 : i32
    %74 = tpu.memref_slice %arg3[%3, %c0_i32_49] : memref<64x128xf32, #tpu.memory_space<any>> -> memref<1x128xf32, #tpu.memory_space<any>>
    %c0_i32_50 = arith.constant 0 : i32
    %c0_i32_51 = arith.constant 0 : i32
    %75 = tpu.memref_slice %arg8[%c0_i32_50, %c0_i32_51] : memref<8x128xf32, #tpu.memory_space<vmem>> -> memref<1x128xf32, #tpu.memory_space<vmem>>
    %76 = tpu.memref_slice %arg9[%c0_i32_48] : memref<8x!tpu.dma_semaphore, #tpu.memory_space<semaphore_mem>> -> memref<1x!tpu.dma_semaphore, #tpu.memory_space<semaphore_mem>>
    %77 = tpu.memref_squeeze %76 : memref<1x!tpu.dma_semaphore, #tpu.memory_space<semaphore_mem>> -> memref<!tpu.dma_semaphore, #tpu.memory_space<semaphore_mem>>
    tpu.wait_dma2 semaphore(%77 : memref<!tpu.dma_semaphore, #tpu.memory_space<semaphore_mem>>) src(%74 : memref<1x128xf32, #tpu.memory_space<any>>) dst(%75 : memref<1x128xf32, #tpu.memory_space<vmem>>)
    %c1_i32_52 = arith.constant 1 : i32
    %c0_i32_53 = arith.constant 0 : i32
    %78 = tpu.memref_slice %arg3[%11, %c0_i32_53] : memref<64x128xf32, #tpu.memory_space<any>> -> memref<1x128xf32, #tpu.memory_space<any>>
    %c1_i32_54 = arith.constant 1 : i32
    %c0_i32_55 = arith.constant 0 : i32
    %79 = tpu.memref_slice %arg8[%c1_i32_54, %c0_i32_55] : memref<8x128xf32, #tpu.memory_space<vmem>> -> memref<1x128xf32, #tpu.memory_space<vmem>>
    %80 = tpu.memref_slice %arg9[%c1_i32_52] : memref<8x!tpu.dma_semaphore, #tpu.memory_space<semaphore_mem>> -> memref<1x!tpu.dma_semaphore, #tpu.memory_space<semaphore_mem>>
    %81 = tpu.memref_squeeze %80 : memref<1x!tpu.dma_semaphore, #tpu.memory_space<semaphore_mem>> -> memref<!tpu.dma_semaphore, #tpu.memory_space<semaphore_mem>>
    tpu.wait_dma2 semaphore(%81 : memref<!tpu.dma_semaphore, #tpu.memory_space<semaphore_mem>>) src(%78 : memref<1x128xf32, #tpu.memory_space<any>>) dst(%79 : memref<1x128xf32, #tpu.memory_space<vmem>>)
    %c2_i32_56 = arith.constant 2 : i32
    %c0_i32_57 = arith.constant 0 : i32
    %82 = tpu.memref_slice %arg3[%19, %c0_i32_57] : memref<64x128xf32, #tpu.memory_space<any>> -> memref<1x128xf32, #tpu.memory_space<any>>
    %c2_i32_58 = arith.constant 2 : i32
    %c0_i32_59 = arith.constant 0 : i32
    %83 = tpu.memref_slice %arg8[%c2_i32_58, %c0_i32_59] : memref<8x128xf32, #tpu.memory_space<vmem>> -> memref<1x128xf32, #tpu.memory_space<vmem>>
    %84 = tpu.memref_slice %arg9[%c2_i32_56] : memref<8x!tpu.dma_semaphore, #tpu.memory_space<semaphore_mem>> -> memref<1x!tpu.dma_semaphore, #tpu.memory_space<semaphore_mem>>
    %85 = tpu.memref_squeeze %84 : memref<1x!tpu.dma_semaphore, #tpu.memory_space<semaphore_mem>> -> memref<!tpu.dma_semaphore, #tpu.memory_space<semaphore_mem>>
    tpu.wait_dma2 semaphore(%85 : memref<!tpu.dma_semaphore, #tpu.memory_space<semaphore_mem>>) src(%82 : memref<1x128xf32, #tpu.memory_space<any>>) dst(%83 : memref<1x128xf32, #tpu.memory_space<vmem>>)
    %c3_i32_60 = arith.constant 3 : i32
    %c0_i32_61 = arith.constant 0 : i32
    %86 = tpu.memref_slice %arg3[%27, %c0_i32_61] : memref<64x128xf32, #tpu.memory_space<any>> -> memref<1x128xf32, #tpu.memory_space<any>>
    %c3_i32_62 = arith.constant 3 : i32
    %c0_i32_63 = arith.constant 0 : i32
    %87 = tpu.memref_slice %arg8[%c3_i32_62, %c0_i32_63] : memref<8x128xf32, #tpu.memory_space<vmem>> -> memref<1x128xf32, #tpu.memory_space<vmem>>
    %88 = tpu.memref_slice %arg9[%c3_i32_60] : memref<8x!tpu.dma_semaphore, #tpu.memory_space<semaphore_mem>> -> memref<1x!tpu.dma_semaphore, #tpu.memory_space<semaphore_mem>>
    %89 = tpu.memref_squeeze %88 : memref<1x!tpu.dma_semaphore, #tpu.memory_space<semaphore_mem>> -> memref<!tpu.dma_semaphore, #tpu.memory_space<semaphore_mem>>
    tpu.wait_dma2 semaphore(%89 : memref<!tpu.dma_semaphore, #tpu.memory_space<semaphore_mem>>) src(%86 : memref<1x128xf32, #tpu.memory_space<any>>) dst(%87 : memref<1x128xf32, #tpu.memory_space<vmem>>)
    %c4_i32_64 = arith.constant 4 : i32
    %c0_i32_65 = arith.constant 0 : i32
    %90 = tpu.memref_slice %arg3[%35, %c0_i32_65] : memref<64x128xf32, #tpu.memory_space<any>> -> memref<1x128xf32, #tpu.memory_space<any>>
    %c4_i32_66 = arith.constant 4 : i32
    %c0_i32_67 = arith.constant 0 : i32
    %91 = tpu.memref_slice %arg8[%c4_i32_66, %c0_i32_67] : memref<8x128xf32, #tpu.memory_space<vmem>> -> memref<1x128xf32, #tpu.memory_space<vmem>>
    %92 = tpu.memref_slice %arg9[%c4_i32_64] : memref<8x!tpu.dma_semaphore, #tpu.memory_space<semaphore_mem>> -> memref<1x!tpu.dma_semaphore, #tpu.memory_space<semaphore_mem>>
    %93 = tpu.memref_squeeze %92 : memref<1x!tpu.dma_semaphore, #tpu.memory_space<semaphore_mem>> -> memref<!tpu.dma_semaphore, #tpu.memory_space<semaphore_mem>>
    tpu.wait_dma2 semaphore(%93 : memref<!tpu.dma_semaphore, #tpu.memory_space<semaphore_mem>>) src(%90 : memref<1x128xf32, #tpu.memory_space<any>>) dst(%91 : memref<1x128xf32, #tpu.memory_space<vmem>>)
    %c5_i32_68 = arith.constant 5 : i32
    %c0_i32_69 = arith.constant 0 : i32
    %94 = tpu.memref_slice %arg3[%43, %c0_i32_69] : memref<64x128xf32, #tpu.memory_space<any>> -> memref<1x128xf32, #tpu.memory_space<any>>
    %c5_i32_70 = arith.constant 5 : i32
    %c0_i32_71 = arith.constant 0 : i32
    %95 = tpu.memref_slice %arg8[%c5_i32_70, %c0_i32_71] : memref<8x128xf32, #tpu.memory_space<vmem>> -> memref<1x128xf32, #tpu.memory_space<vmem>>
    %96 = tpu.memref_slice %arg9[%c5_i32_68] : memref<8x!tpu.dma_semaphore, #tpu.memory_space<semaphore_mem>> -> memref<1x!tpu.dma_semaphore, #tpu.memory_space<semaphore_mem>>
    %97 = tpu.memref_squeeze %96 : memref<1x!tpu.dma_semaphore, #tpu.memory_space<semaphore_mem>> -> memref<!tpu.dma_semaphore, #tpu.memory_space<semaphore_mem>>
    tpu.wait_dma2 semaphore(%97 : memref<!tpu.dma_semaphore, #tpu.memory_space<semaphore_mem>>) src(%94 : memref<1x128xf32, #tpu.memory_space<any>>) dst(%95 : memref<1x128xf32, #tpu.memory_space<vmem>>)
    %c6_i32_72 = arith.constant 6 : i32
    %c0_i32_73 = arith.constant 0 : i32
    %98 = tpu.memref_slice %arg3[%51, %c0_i32_73] : memref<64x128xf32, #tpu.memory_space<any>> -> memref<1x128xf32, #tpu.memory_space<any>>
    %c6_i32_74 = arith.constant 6 : i32
    %c0_i32_75 = arith.constant 0 : i32
    %99 = tpu.memref_slice %arg8[%c6_i32_74, %c0_i32_75] : memref<8x128xf32, #tpu.memory_space<vmem>> -> memref<1x128xf32, #tpu.memory_space<vmem>>
    %100 = tpu.memref_slice %arg9[%c6_i32_72] : memref<8x!tpu.dma_semaphore, #tpu.memory_space<semaphore_mem>> -> memref<1x!tpu.dma_semaphore, #tpu.memory_space<semaphore_mem>>
    %101 = tpu.memref_squeeze %100 : memref<1x!tpu.dma_semaphore, #tpu.memory_space<semaphore_mem>> -> memref<!tpu.dma_semaphore, #tpu.memory_space<semaphore_mem>>
    tpu.wait_dma2 semaphore(%101 : memref<!tpu.dma_semaphore, #tpu.memory_space<semaphore_mem>>) src(%98 : memref<1x128xf32, #tpu.memory_space<any>>) dst(%99 : memref<1x128xf32, #tpu.memory_space<vmem>>)
    %c7_i32_76 = arith.constant 7 : i32
    %c0_i32_77 = arith.constant 0 : i32
    %102 = tpu.memref_slice %arg3[%59, %c0_i32_77] : memref<64x128xf32, #tpu.memory_space<any>> -> memref<1x128xf32, #tpu.memory_space<any>>
    %c7_i32_78 = arith.constant 7 : i32
    %c0_i32_79 = arith.constant 0 : i32
    %103 = tpu.memref_slice %arg8[%c7_i32_78, %c0_i32_79] : memref<8x128xf32, #tpu.memory_space<vmem>> -> memref<1x128xf32, #tpu.memory_space<vmem>>
    %104 = tpu.memref_slice %arg9[%c7_i32_76] : memref<8x!tpu.dma_semaphore, #tpu.memory_space<semaphore_mem>> -> memref<1x!tpu.dma_semaphore, #tpu.memory_space<semaphore_mem>>
    %105 = tpu.memref_squeeze %104 : memref<1x!tpu.dma_semaphore, #tpu.memory_space<semaphore_mem>> -> memref<!tpu.dma_semaphore, #tpu.memory_space<semaphore_mem>>
    tpu.wait_dma2 semaphore(%105 : memref<!tpu.dma_semaphore, #tpu.memory_space<semaphore_mem>>) src(%102 : memref<1x128xf32, #tpu.memory_space<any>>) dst(%103 : memref<1x128xf32, #tpu.memory_space<vmem>>)
    %c0_80 = arith.constant 0 : index
    %c0_81 = arith.constant 0 : index
    %106 = vector.load %arg8[%c0_80, %c0_81] : memref<8x128xf32, #tpu.memory_space<vmem>>, vector<8x128xf32>
    %c0_82 = arith.constant 0 : index
    %c0_83 = arith.constant 0 : index
    %c0_84 = arith.constant 0 : index
    %107 = vector.load %arg5[%c0_82, %c0_83, %c0_84] : memref<1x8x128xf32, #tpu.memory_space<vmem>>, vector<1x8x128xf32>
    %108 = vector.shape_cast %107 : vector<1x8x128xf32> to vector<8x128xf32>
    %109 = arith.addf %106, %108 : vector<8x128xf32>
    %c0_85 = arith.constant 0 : index
    %c0_86 = arith.constant 0 : index
    %c0_87 = arith.constant 0 : index
    %110 = vector.load %arg7[%c0_85, %c0_86, %c0_87] : memref<1x24x128xf32, #tpu.memory_space<vmem>>, vector<1x8x128xf32>
    %111 = vector.shape_cast %110 : vector<1x8x128xf32> to vector<8x128xf32>
    %112 = vector.shape_cast %109 : vector<8x128xf32> to vector<1x8x128xf32>
    tpu.vector_store %arg7[%c0_85, %c0_86, %c0_87], %112 {strides = array<i32>} : memref<1x24x128xf32, #tpu.memory_space<vmem>>, vector<1x8x128xf32>,
    return
  }
  func.func @transform_0(%arg0: i32, %arg1: memref<16xi32, #tpu.memory_space<smem>>) -> (i32, i32, i32) {
    %c0_i32 = arith.constant 0 : i32
    %c0_i32_0 = arith.constant 0 : i32
    %c0_i32_1 = arith.constant 0 : i32
    return %arg0, %c0_i32, %c0_i32_0 : i32, i32, i32
  }
  func.func @transform_2(%arg0: i32, %arg1: memref<16xi32, #tpu.memory_space<smem>>) -> (i32, i32) {
    %c0_i32 = arith.constant 0 : i32
    %c0_i32_0 = arith.constant 0 : i32
    %c0_i32_1 = arith.constant 0 : i32
    return %c0_i32, %c0_i32_0 : i32, i32
  }
  func.func @transform_3(%arg0: i32, %arg1: memref<16xi32, #tpu.memory_space<smem>>) -> (i32, i32, i32) {
    %c0_i32 = arith.constant 0 : i32
    %c0_i32_0 = arith.constant 0 : i32
    %c0_i32_1 = arith.constant 0 : i32
    %c0_i32_2 = arith.constant 0 : i32
    return %c0_i32, %c0_i32_0, %c0_i32_1 : i32, i32, i32
  }
  func.func @transform_4(%arg0: i32, %arg1: memref<16xi32, #tpu.memory_space<smem>>) -> (i32, i32, i32) {
    %c0_i32 = arith.constant 0 : i32
    %c0_i32_0 = arith.constant 0 : i32
    %c0_i32_1 = arith.constant 0 : i32
    %c0_i32_2 = arith.constant 0 : i32
    return %c0_i32, %c0_i32_0, %c0_i32_1 : i32, i32, i32
  }
  func.func @transform_5(%arg0: i32, %arg1: memref<16xi32, #tpu.memory_space<smem>>) -> (i32, i32, i32) {
    %c0_i32 = arith.constant 0 : i32
    %c0_i32_0 = arith.constant 0 : i32
    %c0_i32_1 = arith.constant 0 : i32
    return %arg0, %c0_i32, %c0_i32_0 : i32, i32, i32
  }
}

</mosaic_0001>

<bundles_post_ra>
// kernel: tpu_custom_call.1
= control target key start
LH: loop header
LB: loop body
LE: loop exit
PB: predicated region body
PF: predicated region fallthrough
CT: control target
= control target key end

     0   :  { %s1242_s21 = smov [#allocation5]   ;;  %s1653_s0 = inlined_call_operand.hbm [shape: s32[16], index: 0, kind: input, shape index: {}]   ;;  %s1654_s1 = inlined_call_operand.hbm [shape: f32[2,16,64], index: 1, kind: input, shape index: {}]   ;;  %s1655_s2 = inlined_call_operand.hbm [shape: f32[64,128], index: 2, kind: input, shape index: {}]   ;;  %s1656_s3 = inlined_call_operand.hbm [shape: f32[64,128], index: 3, kind: input, shape index: {}]   ;;  %s1657_s4 = inlined_call_operand.hbm [shape: f32[1,8,128], index: 4, kind: input, shape index: {}]   ;;  %s1658_s5 = inlined_call_operand.hbm [shape: f32[1,16,128], index: 5, kind: input, shape index: {}]   ;;  %s1659_s6 = inlined_call_operand.hbm [shape: f32[2,24,128], index: 6, kind: output, shape index: {}]  }
   0x1   :  { %1666 = sst [smem:[#allocation48_spill]] %s1654_s1 }
   0x2   :  { %1667 = sst [smem:[#allocation49_spill]] %s1656_s3 }
   0x3   :  { %1668 = sst [smem:[#allocation50_spill]] %s1657_s4 }
   0x4   :  { %1669 = sst [smem:[#allocation51_spill]] %s1658_s5 }
   0x5   :  { %12 = dma.hbm_to_smem %s1653_s0, 16, %s1242_s21, [#allocation4] }
   0x6   :  { %1192 = dma.done.wait [#allocation4], 16 }
   0x7   :  { %1193 = vsyncadd [#allocation4], 4294967280 }
   0x8   :  { %14 = sfence }
   0x9   :  { %15 = vsyncpa [#allocation7], 0 }
   0xa   :  { %17 = vsyncpa [#allocation7 + $0x1], 0 }
   0xb   :  { %18 = vsyncpa [#allocation10], 0 }
   0xc   :  { %19 = vsyncpa [#allocation13], 0 }
   0xd   :  { %20 = vsyncpa [#allocation8], 0 }
   0xe   :  { %22 = vsyncpa [#allocation8 + $0x1], 0  ;;  %s1298_s24 = smov 0   ;;  %s1300_s25 = smov 0  }
   0xf   :  { %s1302_s26 = smov 0   ;;  %s1304_s27 = smov 0  }
  0x10 LB: > { %1670 = sst [smem:[#allocation46_spill]] %s1236_s26  ;;  %s1319_s0 = sadd.s32 4294967295, %s1240_s27   ;;  %s1240_s27 = sphi %s1304_s27, %s1697_s27   ;;  %s1236_s26 = sphi %s1302_s26, %s1694_s26   ;;  %s1232_s25 = sphi %s1300_s25, %s1696_s25   ;;  %s1228_s24 = sphi %s1298_s24, %s1695_s24  }
  0x11   : > { %s702_s28 = sadd.s32 4294967294, %s1240_s27   ;;  %p48_p0 = scmp.ne.s32.totalorder %s1232_s25, %s1228_s24 }
  0x12   : > { %p1660_p1 = scmp.eq.s32.totalorder %s1319_s0, 0  ;;  %p141_p3 = scmp.eq.s32.totalorder %s702_s28, 1 }
  0x13   : > { %p703_p5 = scmp.ge.s32.totalorder %s1240_s27, 1  ;;  %p148_p7 = scmp.lt.s32.totalorder %s1240_s27, 3 }
  0x14   : > { %p1328_p4 = por %p1660_p1, %p48_p0  ;;  %p1333_p6 = por %p141_p3, %p48_p0 }
  0x15   : > { %p1338_p8 = pnand %p703_p5, %p148_p7  ;;  %s1243_s8 = smov [#allocation9]  }
  0x16   : > { %s1671_s29 = scalar_select %p1328_p4, 1, 0 }
  0x17   : > { %s1672_s30 = scalar_select %p1333_p6, 1, 0 }
  0x18   : > { %s1673_s7 = scalar_select %p1338_p8, 1, 0 }
  0x19   : > { %s160_s9 = sshll.u32 %s1243_s8, 4  ;;  %p786_p9 = pneg %p1338_p8  ;;  %s161_s9 = int_to_ptr.vmem [resolvable:$true] %s160_s9 }
  0x1a   : > { %s1244_s11 = smov [#allocation11]   ;;  %s1245_s13 = smov [#allocation12]  }
  0x1b   : > { %p1347_p11 = pnand %p786_p9, %p1660_p1  ;;  %s174_s12 = sshll.u32 %s1244_s11, 4  ;;  %s175_s12 = int_to_ptr.vmem [resolvable:$true] %s174_s12 }
  0x1c   : > { %s184_s14 = sshll.u32 %s1245_s13, 4  ;;  %s879_s15 = scalar_lea.vmem %s161_s9, 1024  ;;  %s185_s14 = int_to_ptr.vmem [resolvable:$true] %s184_s14 }
  0x1d   : > { %p870_p12 = pneg %p1347_p11  ;;  %p880_p13 = scmp.ne.s32.totalorder %s161_s9, %s879_s15 }
  0x1e   : > { %p887_p5 = scmp.lt.s32.totalorder %s161_s9, %s161_s9  ;;  %p888_p7 = scmp.lt.s32.totalorder %s879_s15, %s879_s15 }
  0x1f   : > { %p882_p0 = pnand %p880_p13, %p870_p12 }
  0x20   : > { %p889_p9 = por %p888_p7, %p887_p5 }
  0x21   : > { %p883_p3 = pneg %p882_p0 }
  0x23   : > { %p890_p10 = pnand %p889_p9, %p883_p3 }
  0x25   : > { %893 = shalt.err (!%p890_p10)
}
  0x26   : > { %s1662_s16 = smov 128   ;;  %s1247_s17 = smov 8  }
  0x27   : > { %s1675_s3 = sld [smem:[#allocation49_spill]]  ;;  %s905_s20 = scalar_lea.vmem %s175_s12, 128 }
  0x28   : > { %p906_p13 = scmp.ne.s32.totalorder %s175_s12, %s905_s20  ;;  %p913_p3 = scmp.lt.s32.totalorder %s175_s12, %s175_s12 }
  0x29   : > { %p914_p10 = scmp.lt.s32.totalorder %s905_s20, %s905_s20 }
  0x2a   : > { %p908_p0 = pnand %p906_p13, %p870_p12 }
  0x2b   : > { %p915_p7 = por %p914_p10, %p913_p3 }
  0x2c   : > { %p909_p5 = pneg %p908_p0 }
  0x2d   : > { %789 = dma.hbm_to_vmem [thread:$0]  (!%p1347_p11), %s1675_s3, 1024, %s161_s9, [#allocation10], %s1662_s16, %s1662_s16, %s1247_s17  }
  0x2e   : > { %p916_p9 = pnand %p915_p7, %p909_p5 }
  0x30   : > { %919 = shalt.err (!%p916_p9)
}
  0x31   : > { %s1676_s4 = sld [smem:[#allocation50_spill]]  ;;  %s931_s23 = scalar_lea.vmem %s185_s14, 256 }
  0x32   : > { %p932_p1 = scmp.ne.s32.totalorder %s185_s14, %s931_s23  ;;  %p939_p0 = scmp.lt.s32.totalorder %s185_s14, %s185_s14 }
  0x33   : > { %p940_p6 = scmp.lt.s32.totalorder %s931_s23, %s931_s23 }
  0x34   : > { %p934_p2 = pnand %p932_p1, %p870_p12 }
  0x35   : > { %p941_p4 = por %p940_p6, %p939_p0 }
  0x36   : > { %p935_p13 = pneg %p934_p2 }
  0x37   : > { %792 = dma.hbm_to_vmem [thread:$0]  (!%p1347_p11), %s1676_s4, 128, %s175_s12, [#allocation10]  }
  0x38   : > { %p942_p3 = pnand %p941_p4, %p935_p13 }
  0x3a   : > { %945 = shalt.err (!%p942_p3)
}
  0x3b   : > { %s1677_s5 = sld [smem:[#allocation51_spill]]  ;;  %s1384_s9 = sadd.s32 1, %s1240_s27  }
  0x3c   : > { %s32_s10 = ssub.s32 %s1240_s27, %s1384_s9  ;;  %s35_s11 = sadd.s32 1, %s1236_s26 }
  0x3d   : > { %p33_p1 = scmp.eq.s32.totalorder %s32_s10, 0  ;;  %p42_p2 = scmp.ne.s32.totalorder %s1236_s26, %s1232_s25 }
  0x3e   : > { %p43_p4 = scmp.eq.s32.totalorder %s1240_s27, 0  ;;  %p807_p6 = scmp.lt.s32.totalorder %s1240_s27, 2 }
  0x3f   : > { %s1394_s12 = scalar_select %p33_p1, %s1236_s26, %s35_s11  }
  0x40   : > { %p44_p12 = por %p43_p4, %p42_p2  ;;  %p1679_p5 = scmp.eq.s32.totalorder %s1319_s0, 1 }
  0x41   : > { %795 = dma.hbm_to_vmem [thread:$0]  (!%p1347_p11), %s1677_s5, 256, %s185_s14, [#allocation13], %s1662_s16, %s1662_s16, %s1247_s17  }
  0x42   : > { %1678 = sst [smem:[#allocation47_spill]] %s1394_s12  ;;  %p1398_p10 = por %p1679_p5, %p42_p2 }
  0x43   : > { %s198_s15 = sand.u32 1, %s1236_s26   ;;  %s738_s18 = sshll.u32 %s1240_s27, 8 }
  0x44   : > { %s1680_s13 = scalar_select %p1398_p10, 1, 0 }
  0x45   : > { %s708_s14 = sshll.u32 %s198_s15, 4  ;;  %s1681_s1 = sld [smem:[#allocation48_spill]] }
  0x46   : > { %s202_s22 = scalar_lea.vmem [#allocation6], %s708_s14  ;;  %p1409_p11 = pnand %p807_p6, %p44_p12 }
  0x47   : > { %s209_s23 = sshll.u32 %s202_s22, 4  ;;  %s1415_s8 = scalar_lea.sflag [#allocation7], %s198_s15  ;;  %s1413_s23 = int_to_ptr.vmem [resolvable:$true] %s209_s23 }
  0x48   : > { %p948_p9 = pneg %p1409_p11 }
  0x4b   : > { %s1407_s21 = scalar_lea.hbm %s1681_s1, %s738_s18  ;;  %s951_s14 = scalar_lea.hbm %s1681_s1, 512 }
  0x4c   : > { %s946_s10 = scalar_lea.hbm %s1407_s21, 256  ;;  %p952_p3 = scmp.lt.s32.totalorder %s1407_s21, %s1681_s1 }
  0x4d   : > { %p947_p7 = scmp.ne.s32.totalorder %s1407_s21, %s946_s10  ;;  %p953_p1 = scmp.lt.s32.totalorder %s951_s14, %s946_s10 }
  0x4f   : > { %p949_p13 = pnand %p948_p9, %p947_p7  ;;  %p954_p2 = por %p953_p1, %p952_p3 }
  0x51   : > { %p950_p0 = pneg %p949_p13 }
  0x53   : > { %p955_p4 = pnand %p954_p2, %p950_p0 }
  0x55   : > { %958 = shalt.err (!%p955_p4)
}
  0x56   : > { %s959_s15 = scalar_lea.vmem %s1413_s23, 256  ;;  %s1248_s22 = smov [#allocation6]  }
  0x57   : > { %p960_p6 = scmp.ne.s32.totalorder %s1413_s23, %s959_s15  ;;  %s964_s16 = sshll.u32 %s1248_s22, 4  ;;  %s965_s16 = int_to_ptr.vmem [resolvable:$false] %s964_s16 }
  0x58   : > { %s966_s11 = scalar_lea.vmem %s965_s16, 512  ;;  %p967_p7 = scmp.lt.s32.totalorder %s1413_s23, %s965_s16 }
  0x59   : > { %p962_p12 = pnand %p960_p6, %p948_p9  ;;  %p968_p13 = scmp.lt.s32.totalorder %s966_s11, %s959_s15 }
  0x5b   : > { %p963_p5 = pneg %p962_p12  ;;  %p969_p10 = por %p968_p13, %p967_p7 }
  0x5d   : > { %p970_p8 = pnand %p969_p10, %p963_p5 }
  0x5f   : > { %973 = shalt.err (!%p970_p8)
}
  0x60   : > { %s1683_s10 = smov 128   ;;  %p1684_p9 = scmp.ne.s32.totalorder %s1673_s7, 0 }
  0x61   : > { %799 = dma.hbm_to_vmem [thread:$0]  (!%p1409_p11), %s1407_s21, 256, %s1413_s23, %s1415_s8, %s1683_s10, %s1683_s10, %s1247_s17  }
  0x62   : > { %221 = sbr.rel (%p1684_p9) target bundleno = 420 (0x1a4), region = 36  ;;  %s1442_s18 = sand.u32 (!%p1684_p9), 1, %s1232_s25  }
  0x63   : > { %s712_s16 = sshll.u32 (!%p1684_p9), %s1442_s18, 4  ;;  %s224_s14 = scalar_lea.sflag (!%p1684_p9), [#allocation7], %s1442_s18 }
  0x64   : > { %s1446_s19 = scalar_lea.vmem (!%p1684_p9), [#allocation6], %s712_s16  ;;  %p1685_p8 = scmp.ne.s32.totalorder (!%p1684_p9), %s1671_s29, 0 }
  0x67   : > { %1195 = dma.done.wait (%p1685_p8), %s224_s14, 256  }
  0x68   : > { %1197 = vsyncadd (%p1685_p8), %s224_s14, 4294967040  ;;  %p1686_p10 = scmp.eq.s32.totalorder %s1319_s0, 0 }
  0x6a   : > { %1199 = dma.done.wait (%p1686_p10), [#allocation10], 1152   ;;  %p1687_p11 = pmov %p1686_p10 }
  0x6b   : > { %p1688_p0 = pmov %p1686_p10 }
  0x6c   : > { %1201 = vsyncadd (%p1687_p11), [#allocation10], 4294966144 }
  0x6d   : > { %1203 = dma.done.wait (%p1688_p0), [#allocation13], 256   ;;  %p1689_p3 = pmov %p1688_p0 }
  0x6e   : > { %s1461_s7 = sshll.u32 %s1319_s0, 3  ;;  %s1249_s17 = smov [#allocation2]   ;;  %v407_v0 = vld [vmem:[#allocation9 + $0x38] sm:$0xff]  ;;  %v406_v1 = vld [vmem:[#allocation9 + $0x30] sm:$0xff]  ;;  %vm410_vm0 = vcmask 523264   ;;  %v405_v2 = vld [vmem:[#allocation9 + $0x28] sm:$0xff] }
  0x6f   : > { %1205 = vsyncadd (%p1689_p3), [#allocation13], 4294967040  ;;  %s265_s29 = sld [smem:[#allocation5 + %s1461_s7]]  ;;  %s275_s21 = sshll.u32 %s1249_s17, 4  ;;  %749 = vmatprep.subr.mxu0 %v407_v0  ;;  %v398_v3 = vld [vmem:[%s1446_s19] sm:$0xff]  ;;  %s1470_s21 = int_to_ptr.vmem [resolvable:$true] %s275_s21 }
  0x70   : > { %s279_s23 = sadd.s32 1, %s1461_s7  ;;  %s296_s8 = sadd.s32 2, %s1461_s7  ;;  %750 = vmatpush3.msra.mxu0 %v407_v0 }
  0x71   : > { %s1465_s28 = sld [smem:[#allocation5 + %s279_s23]]  ;;  %s1250_s20 = smov [#allocation2 + $0x1]  }
  0x72   : > { %s292_s15 = sshll.u32 %s1250_s20, 4  ;;  %s1468_s22 = sld [smem:[#allocation5 + %s296_s8]]  ;;  %s1475_s15 = int_to_ptr.vmem [resolvable:$true] %s292_s15 }
  0x73   : > { %s1251_s10 = smov [#allocation2 + $0x2]   ;;  %s1481_s3 = scalar_lea.hbm %s1655_s2, 1024 }
  0x74   : > { %s309_s16 = sshll.u32 %s1251_s10, 4  ;;  %s1498_s16 = int_to_ptr.vmem [resolvable:$true] %s309_s16 }
  0x75   : > { %s717_s11 = sshll.u32 %s265_s29, 4 }
  0x76   : > { %s267_s23 = scalar_lea.hbm %s1655_s2, %s717_s11 }
  0x77   : > { %s974_s8 = scalar_lea.hbm %s267_s23, 16  ;;  %p977_p2 = scmp.lt.s32.totalorder %s267_s23, %s1655_s2 }
  0x78   : > { %p975_p1 = scmp.ne.s32.totalorder %s267_s23, %s974_s8  ;;  %p978_p4 = scmp.lt.s32.totalorder %s1481_s3, %s974_s8 }
  0x7a   : > { %p979_p6 = por %p978_p4, %p977_p2 }
  0x7c   : > { %p980_p12 = pnand %p979_p6, %p975_p1 }
  0x7e   : > { %983 = shalt.err (!%p980_p12)  }
  0x7f   : > { %s984_s11 = scalar_lea.vmem %s1470_s21, 16  ;;  %s1490_s10 = scalar_lea.vmem %s1470_s21, 128 }
  0x80   : > { %p985_p5 = scmp.ne.s32.totalorder %s1470_s21, %s984_s11  ;;  %p989_p7 = scmp.lt.s32.totalorder %s1470_s21, %s1470_s21 }
  0x81   : > { %p990_p13 = scmp.lt.s32.totalorder %s1490_s10, %s984_s11 }
  0x83   : > { %p991_p9 = por %p990_p13, %p989_p7 }
  0x85   : > { %p992_p8 = pnand %p991_p9, %p985_p5 }
  0x87   : > { %995 = shalt.err (!%p992_p8)  }
  0x88   : > { %278 = dma.hbm_to_vmem [thread:$0]  %s267_s23, 16, %s1470_s21, [#allocation3]  ;;  %751 = vmatprep.subr.mxu0 %v406_v1  ;;  %765 = vmatprep.mubr.msk.f32.mxu0 %vm410_vm0, %v398_v3  ;;  %v404_v4 = vld [vmem:[#allocation9 + $0x20] sm:$0xff] }
  0x89   : > { %s718_s1 = sshll.u32 %s1465_s28, 4  ;;  %752 = vmatpush3.msra.mxu0 %v406_v1  ;;  %s719_s8 = sshll.u32 %s1468_s22, 4 }
  0x8a   : > { %s282_s17 = scalar_lea.hbm %s1655_s2, %s718_s1  ;;  %753 = vmatprep.subr.mxu0 %v405_v2 }
  0x8b   : > { %s996_s20 = scalar_lea.hbm %s282_s17, 16  ;;  %p999_p11 = scmp.lt.s32.totalorder %s282_s17, %s1655_s2 }
  0x8c   : > { %p997_p10 = scmp.ne.s32.totalorder %s282_s17, %s996_s20  ;;  %p1000_p0 = scmp.lt.s32.totalorder %s1481_s3, %s996_s20 }
  0x8e   : > { %p1001_p3 = por %p1000_p0, %p999_p11 }
  0x90   : > { %p1002_p1 = pnand %p1001_p3, %p997_p10 }
  0x92   : > { %1005 = shalt.err (!%p1002_p1)  }
  0x93   : > { %s1006_s28 = scalar_lea.vmem %s1475_s15, 16  ;;  %p1011_p4 = scmp.lt.s32.totalorder %s1475_s15, %s1470_s21 }
  0x94   : > { %p1007_p2 = scmp.ne.s32.totalorder %s1475_s15, %s1006_s28  ;;  %p1012_p6 = scmp.lt.s32.totalorder %s1490_s10, %s1006_s28 }
  0x96   : > { %p1013_p12 = por %p1012_p6, %p1011_p4 }
  0x98   : > { %p1014_p5 = pnand %p1013_p12, %p1007_p2 }
  0x9a   : > { %1017 = shalt.err (!%p1014_p5)  }
  0x9b   : > { %295 = dma.hbm_to_vmem [thread:$0]  %s282_s17, 16, %s1475_s15, [#allocation3 + $0x1]  ;;  %754 = vmatpush3.msra.mxu0 %v405_v2  ;;  %v403_v5 = vld [vmem:[#allocation9 + $0x18] sm:$0xff] }
  0x9c   : > { %s299_s1 = scalar_lea.hbm %s1655_s2, %s719_s8  ;;  %755 = vmatprep.subr.mxu0 %v404_v4 }
  0x9d   : > { %s1018_s4 = scalar_lea.hbm %s299_s1, 16  ;;  %p1021_p13 = scmp.lt.s32.totalorder %s299_s1, %s1655_s2 }
  0x9e   : > { %p1019_p7 = scmp.ne.s32.totalorder %s299_s1, %s1018_s4  ;;  %p1022_p9 = scmp.lt.s32.totalorder %s1481_s3, %s1018_s4 }
  0xa0   : > { %p1023_p8 = por %p1022_p9, %p1021_p13 }
  0xa2   : > { %p1024_p10 = pnand %p1023_p8, %p1019_p7 }
  0xa4   : > { %1027 = shalt.err (!%p1024_p10)  }
  0xa5   : > { %s1028_s15 = scalar_lea.vmem %s1498_s16, 16  ;;  %p1033_p0 = scmp.lt.s32.totalorder %s1498_s16, %s1470_s21 }
  0xa6   : > { %p1029_p11 = scmp.ne.s32.totalorder %s1498_s16, %s1028_s15  ;;  %p1034_p3 = scmp.lt.s32.totalorder %s1490_s10, %s1028_s15 }
  0xa8   : > { %p1035_p1 = por %p1034_p3, %p1033_p0 }
  0xaa   : > { %p1036_p2 = pnand %p1035_p1, %p1029_p11 }
  0xac   : > { %1039 = shalt.err (!%p1036_p2)  }
  0xad   : > { %312 = dma.hbm_to_vmem [thread:$0]  %s299_s1, 16, %s1498_s16, [#allocation3 + $0x2]  ;;  %756 = vmatpush3.msra.mxu0 %v404_v4  ;;  %v402_v6 = vld [vmem:[#allocation9 + $0x10] sm:$0xff]  ;;  %v401_v7 = vld [vmem:[#allocation9 + $0x8] sm:$0xff]  ;;  %v400_v8 = vld [vmem:[#allocation9] sm:$0xff] }
  0xae   : > { %757 = vmatprep.subr.mxu0 %v403_v5  ;;  %v399_v9 = vld [vmem:[%s1446_s19 + $0x8] sm:$0xff]  ;;  %s313_s16 = sadd.s32 3, %s1461_s7  ;;  %s330_s8 = sadd.s32 4, %s1461_s7 }
  0xaf   : > { %758 = vmatpush3.msra.mxu0 %v403_v5  ;;  %s314_s17 = sld [smem:[#allocation5 + %s313_s16]]  ;;  %s347_s11 = sadd.s32 5, %s1461_s7 }
  0xb0   : > { %759 = vmatprep.subr.mxu0 %v402_v6  ;;  %s1531_s29 = sld [smem:[#allocation5 + %s330_s8]]  ;;  %s364_s28 = sadd.s32 6, %s1461_s7 }
  0xb1   : > { %760 = vmatpush3.msra.mxu0 %v402_v6  ;;  %s1535_s22 = sld [smem:[#allocation5 + %s347_s11]]  ;;  %s381_s23 = sadd.s32 7, %s1461_s7 }
  0xb2   : > { %761 = vmatprep.subr.mxu0 %v401_v7  ;;  %s1538_s1 = sld [smem:[#allocation5 + %s364_s28]]  ;;  %s1252_s14 = smov [#allocation2 + $0x3]  }
  0xb3   : > { %762 = vmatpush3.msra.mxu0 %v401_v7  ;;  %s1540_s4 = sld [smem:[#allocation5 + %s381_s23]]  ;;  %s326_s20 = sshll.u32 %s1252_s14, 4  ;;  %s327_s20 = int_to_ptr.vmem [resolvable:$true] %s326_s20 }
  0xb4   : > { %763 = vmatprep.subr.mxu0 %v400_v8 }
  0xb5   : > { %764 = vmatpush3.msra.mxu0 %v400_v8  ;;  %s720_s19 = sshll.u32 %s314_s17, 4 }
  0xb6   : > { %766 = vmatmul.mubr.msk.f32.vlgmr.msra.gmra.mxu0 %vm410_vm0, %v399_v9  ;;  %s316_s16 = scalar_lea.hbm %s1655_s2, %s720_s19 }
  0xb7   : > { %s1040_s12 = scalar_lea.hbm %s316_s16, 16  ;;  %p1043_p6 = scmp.lt.s32.totalorder %s316_s16, %s1655_s2 }
  0xb8   : > { %p1041_p4 = scmp.ne.s32.totalorder %s316_s16, %s1040_s12  ;;  %p1044_p12 = scmp.lt.s32.totalorder %s1481_s3, %s1040_s12 }
  0xba   : > { %p1045_p5 = por %p1044_p12, %p1043_p6 }
  0xbc   : > { %p1046_p7 = pnand %p1045_p5, %p1041_p4 }
  0xbe   : > { %1049 = shalt.err (!%p1046_p7)  }
  0xbf   : > { %s1050_s7 = scalar_lea.vmem %s327_s20, 16  ;;  %p1055_p9 = scmp.lt.s32.totalorder %s327_s20, %s1470_s21 }
  0xc0   : > { %p1051_p13 = scmp.ne.s32.totalorder %s327_s20, %s1050_s7  ;;  %p1056_p8 = scmp.lt.s32.totalorder %s1490_s10, %s1050_s7 }
  0xc2   : > { %p1057_p10 = por %p1056_p8, %p1055_p9 }
  0xc4   : > { %p1058_p11 = pnand %p1057_p10, %p1051_p13 }
  0xc6   : > { %1061 = shalt.err (!%p1058_p11)  }
  0xc7   : > { %329 = dma.hbm_to_vmem [thread:$0]  %s316_s16, 16, %s327_s20, [#allocation3 + $0x3] }
  0xc8   : > { %s721_s5 = sshll.u32 %s1531_s29, 4  ;;  %s1253_s11 = smov [#allocation2 + $0x4]  }
  0xc9   : > { %s333_s12 = scalar_lea.hbm %s1655_s2, %s721_s5  ;;  %s343_s28 = sshll.u32 %s1253_s11, 4  ;;  %s344_s28 = int_to_ptr.vmem [resolvable:$true] %s343_s28 }
  0xca   : > { %s722_s23 = sshll.u32 %s1535_s22, 4  ;;  %s1062_s19 = scalar_lea.hbm %s333_s12, 16 }
  0xcb   : > { %p1063_p0 = scmp.ne.s32.totalorder %s333_s12, %s1062_s19  ;;  %p1065_p3 = scmp.lt.s32.totalorder %s333_s12, %s1655_s2 }
  0xcc   : > { %p1066_p1 = scmp.lt.s32.totalorder %s1481_s3, %s1062_s19 }
  0xce   : > { %p1067_p2 = por %p1066_p1, %p1065_p3 }
  0xd0   : > { %p1068_p4 = pnand %p1067_p2, %p1063_p0 }
  0xd2   : > { %1071 = shalt.err (!%p1068_p4)  }
  0xd3   : > { %s1072_s20 = scalar_lea.vmem %s344_s28, 16  ;;  %p1077_p12 = scmp.lt.s32.totalorder %s344_s28, %s1470_s21 }
  0xd4   : > { %p1073_p6 = scmp.ne.s32.totalorder %s344_s28, %s1072_s20  ;;  %p1078_p5 = scmp.lt.s32.totalorder %s1490_s10, %s1072_s20 }
  0xd6   : > { %p1079_p7 = por %p1078_p5, %p1077_p12 }
  0xd8   : > { %p1080_p13 = pnand %p1079_p7, %p1073_p6 }
  0xda   : > { %1083 = shalt.err (!%p1080_p13)  }
  0xdb   : > { %346 = dma.hbm_to_vmem [thread:$0]  %s333_s12, 16, %s344_s28, [#allocation3 + $0x4] }
  0xdc   : > { %s350_s16 = scalar_lea.hbm %s1655_s2, %s722_s23  ;;  %s1254_s8 = smov [#allocation2 + $0x5]  }
  0xdd   : > { %s360_s7 = sshll.u32 %s1254_s8, 4  ;;  %s723_s5 = sshll.u32 %s1538_s1, 4  ;;  %s361_s7 = int_to_ptr.vmem [resolvable:$true] %s360_s7 }
  0xde   : > { %s1569_s11 = scalar_lea.hbm %s1655_s2, %s723_s5  ;;  %s1084_s19 = scalar_lea.hbm %s350_s16, 16 }
  0xdf   : > { %p1085_p9 = scmp.ne.s32.totalorder %s350_s16, %s1084_s19  ;;  %p1087_p8 = scmp.lt.s32.totalorder %s350_s16, %s1655_s2 }
  0xe0   : > { %p1088_p10 = scmp.lt.s32.totalorder %s1481_s3, %s1084_s19 }
  0xe2   : > { %p1089_p11 = por %p1088_p10, %p1087_p8 }
  0xe4   : > { %p1090_p0 = pnand %p1089_p11, %p1085_p9 }
  0xe6   : > { %1093 = shalt.err (!%p1090_p0)  }
  0xe7   : > { %s1094_s12 = scalar_lea.vmem %s361_s7, 16  ;;  %p1099_p1 = scmp.lt.s32.totalorder %s361_s7, %s1470_s21 }
  0xe8   : > { %p1095_p3 = scmp.ne.s32.totalorder %s361_s7, %s1094_s12  ;;  %p1100_p2 = scmp.lt.s32.totalorder %s1490_s10, %s1094_s12 }
  0xea   : > { %p1101_p4 = por %p1100_p2, %p1099_p1 }
  0xec   : > { %p1102_p6 = pnand %p1101_p4, %p1095_p3 }
  0xee   : > { %1105 = shalt.err (!%p1102_p6)  }
  0xef   : > { %363 = dma.hbm_to_vmem [thread:$0]  %s350_s16, 16, %s361_s7, [#allocation3 + $0x5] }
  0xf0   : > { %s724_s1 = sshll.u32 %s1540_s4, 4  ;;  %s1255_s28 = smov [#allocation2 + $0x6]  }
  0xf1   : > { %s377_s23 = sshll.u32 %s1255_s28, 4  ;;  %s1581_s22 = scalar_lea.hbm %s1655_s2, %s724_s1  ;;  %s378_s23 = int_to_ptr.vmem [resolvable:$true] %s377_s23 }
  0xf2   : > { %s1106_s8 = scalar_lea.hbm %s1569_s11, 16  ;;  %p1109_p5 = scmp.lt.s32.totalorder %s1569_s11, %s1655_s2 }
  0xf3   : > { %p1107_p12 = scmp.ne.s32.totalorder %s1569_s11, %s1106_s8  ;;  %p1110_p7 = scmp.lt.s32.totalorder %s1481_s3, %s1106_s8 }
  0xf5   : > { %p1111_p13 = por %p1110_p7, %p1109_p5 }
  0xf7   : > { %p1112_p9 = pnand %p1111_p13, %p1107_p12 }
  0xf9   : > { %1115 = shalt.err (!%p1112_p9)  }
  0xfa   : > { %s1116_s16 = scalar_lea.vmem %s378_s23, 16  ;;  %p1121_p10 = scmp.lt.s32.totalorder %s378_s23, %s1470_s21 }
  0xfb   : > { %p1117_p8 = scmp.ne.s32.totalorder %s378_s23, %s1116_s16  ;;  %p1122_p11 = scmp.lt.s32.totalorder %s1490_s10, %s1116_s16 }
  0xfd   : > { %p1123_p0 = por %p1122_p11, %p1121_p10 }
  0xff   : > { %p1124_p3 = pnand %p1123_p0, %p1117_p8 }
 0x101   : > { %1127 = shalt.err (!%p1124_p3)  }
 0x102   : > { %380 = dma.hbm_to_vmem [thread:$0]  %s1569_s11, 16, %s378_s23, [#allocation3 + $0x6] }
 0x103   : > { %s1256_s4 = smov [#allocation2 + $0x7]   ;;  %s1128_s17 = scalar_lea.hbm %s1581_s22, 16 }
 0x104   : > { %s394_s7 = sshll.u32 %s1256_s4, 4  ;;  %p1129_p1 = scmp.ne.s32.totalorder %s1581_s22, %s1128_s17  ;;  %s395_s7 = int_to_ptr.vmem [resolvable:$true] %s394_s7 }
 0x105   : > { %p1131_p2 = scmp.lt.s32.totalorder %s1581_s22, %s1655_s2  ;;  %p1132_p4 = scmp.lt.s32.totalorder %s1481_s3, %s1128_s17 }
 0x107   : > { %p1133_p6 = por %p1132_p4, %p1131_p2 }
 0x109   : > { %p1134_p12 = pnand %p1133_p6, %p1129_p1 }
 0x10b   : > { %1137 = shalt.err (!%p1134_p12)  }
 0x10c   : > { %s1138_s15 = scalar_lea.vmem %s395_s7, 16  ;;  %p1143_p7 = scmp.lt.s32.totalorder %s395_s7, %s1470_s21 }
 0x10d   : > { %p1139_p5 = scmp.ne.s32.totalorder %s395_s7, %s1138_s15  ;;  %p1144_p13 = scmp.lt.s32.totalorder %s1490_s10, %s1138_s15 }
 0x10f   : > { %p1145_p9 = por %p1144_p13, %p1143_p7 }
 0x111   : > { %p1146_p8 = pnand %p1145_p9, %p1139_p5 }
 0x113   : > { %1149 = shalt.err (!%p1146_p8)  }
 0x114   : > { %397 = dma.hbm_to_vmem [thread:$0]  %s1581_s22, 16, %s395_s7, [#allocation3 + $0x7]  ;;  %v409_v10 = vld [vmem:[#allocation12 + $0x8] sm:$0xff]  ;;  %v408_v12 = vld [vmem:[#allocation12] sm:$0xff] }
 0x115   : > { %s768_s11 = smul.u32 24, %s1442_s18 }
 0x117   : > { %s263_s3 = scalar_lea.vmem [#allocation14], %s768_s11 }
 0x176   : > { %v767_v11 = vpop.f32.mrf.mxu0 }
 0x177   : > { %v489_v13 = vadd.f32 %v767_v11, %v409_v10 }
 0x178   : > { %v483_v14 = vpop.f32.mrf.mxu0 }
 0x179   : > { %493 = vst [vmem:[%s263_s3 + $0x10] sm:$0xff] %v489_v13  ;;  %v484_v15 = vadd.f32 %v483_v14, %v408_v12 }
 0x17b   : > { %492 = vst [vmem:[%s263_s3 + $0x8] sm:$0xff] %v484_v15 }
 0x17c   : > { %1206 = dma.done.wait [#allocation3], 16 }
 0x17d   : > { %1207 = vsyncadd [#allocation3], 4294967280 }
 0x17e   : > { %1208 = dma.done.wait [#allocation3 + $0x1], 16 }
 0x17f   : > { %1209 = vsyncadd [#allocation3 + $0x1], 4294967280 }
 0x180   : > { %1210 = dma.done.wait [#allocation3 + $0x2], 16 }
 0x181   : > { %1211 = vsyncadd [#allocation3 + $0x2], 4294967280 }
 0x182   : > { %1212 = dma.done.wait [#allocation3 + $0x3], 16 }
 0x183   : > { %1213 = vsyncadd [#allocation3 + $0x3], 4294967280 }
 0x184   : > { %1214 = dma.done.wait [#allocation3 + $0x4], 16 }
 0x185   : > { %1215 = vsyncadd [#allocation3 + $0x4], 4294967280 }
 0x186   : > { %1216 = dma.done.wait [#allocation3 + $0x5], 16 }
 0x187   : > { %1217 = vsyncadd [#allocation3 + $0x5], 4294967280 }
 0x188   : > { %1218 = dma.done.wait [#allocation3 + $0x6], 16 }
 0x189   : > { %1219 = vsyncadd [#allocation3 + $0x6], 4294967280 }
 0x18a   : > { %1220 = dma.done.wait [#allocation3 + $0x7], 16 }
 0x18b   : > { %1221 = vsyncadd [#allocation3 + $0x7], 4294967280  ;;  %s769_s21 = smul.u32 384, %s1319_s0  ;;  %s529_s10 = sshll.u32 %s263_s3, 4  ;;  %v511_v16 = vld [vmem:[#allocation2] sm:$0xff]  ;;  %v512_v17 = vld [vmem:[#allocation11] sm:$0xff]  ;;  %s1610_s10 = int_to_ptr.vmem [resolvable:$true] %s529_s10 }
 0x18c   : > { %v513_v18 = vadd.f32 %v512_v17, %v511_v16  ;;  %s516_s23 = scalar_lea.sflag [#allocation8], %s1442_s18  ;;  %s1150_s20 = scalar_lea.vmem %s1610_s10, 384 }
 0x18d   : > { %s1608_s28 = scalar_lea.hbm %s1659_s6, %s769_s21  ;;  %p1151_p10 = scmp.ne.s32.totalorder %s1610_s10, %s1150_s20 }
 0x18e   : > { %514 = vst [vmem:[%s263_s3] sm:$0xff] %v513_v18  ;;  %p1690_p11 = scmp.ne.s32.totalorder %s1680_s13, 0  ;;  %s1257_s0 = smov [#allocation14]  }
 0x18f   : > { %s1154_s29 = sshll.u32 %s1257_s0, 4  ;;  %s1155_s29 = int_to_ptr.vmem [resolvable:$false] %s1154_s29 }
 0x190   : > { %p1152_p0 = pnand %p1151_p10, %p1690_p11  ;;  %s1156_s22 = scalar_lea.vmem %s1155_s29, 768 }
 0x191   : > { %p1157_p1 = scmp.lt.s32.totalorder %s1610_s10, %s1155_s29  ;;  %p1158_p2 = scmp.lt.s32.totalorder %s1156_s22, %s1150_s20 }
 0x192   : > { %p1153_p3 = pneg %p1152_p0 }
 0x193   : > { %p1159_p4 = por %p1158_p2, %p1157_p1 }
 0x195   : > { %p1160_p6 = pnand %p1159_p4, %p1153_p3 }
 0x197   : > { %1163 = shalt.err (!%p1160_p6)
}
 0x198   : > { %s1164_s8 = scalar_lea.hbm %s1608_s28, 384  ;;  %s1168_s16 = scalar_lea.hbm %s1659_s6, 768 }
 0x199   : > { %p1165_p12 = scmp.ne.s32.totalorder %s1608_s28, %s1164_s8  ;;  %p1169_p13 = scmp.lt.s32.totalorder %s1608_s28, %s1659_s6 }
 0x19a   : > { %p1170_p9 = scmp.lt.s32.totalorder %s1168_s16, %s1164_s8 }
 0x19b   : > { %p1166_p5 = pnand %p1165_p12, %p1690_p11 }
 0x19c   : > { %p1171_p8 = por %p1170_p9, %p1169_p13 }
 0x19d   : > { %p1167_p7 = pneg %p1166_p5 }
 0x19f   : > { %p1172_p10 = pnand %p1171_p8, %p1167_p7 }
 0x1a1   : > { %1175 = shalt.err (!%p1172_p10)
}
 0x1a2   : > { %s1258_s17 = smov 128   ;;  %s1259_s19 = smov 8  }
 0x1a3   : > { %784 = dma.vmem_to_hbm [thread:$0]  (%p1690_p11), %s1610_s10, 384, %s1608_s28, %s516_s23, %s1258_s17, %s1258_s17, %s1259_s19  }
 0x1a4 PF: > { %s544_s14 = sand.u32 1, %s1228_s24   ;;  %p1691_p0 = scmp.ne.s32.totalorder %s1672_s30, 0 }
 0x1a5   : > { %p1692_p3 = scmp.ge.s32.totalorder %s1240_s27, 2  ;;  %s545_s15 = scalar_lea.sflag [#allocation8], %s544_s14 }
 0x1a7   : > { %p801_p1 = pnand %p1692_p3, %p1691_p0 }
 0x1a9   : > { %p802_p2 = pneg %p801_p1 }
 0x1ab   : > { %1223 = dma.done.wait (%p802_p2), %s545_s15, 384  }
 0x1ac   : > { %1225 = vsyncadd (%p802_p2), %s545_s15, 4294966912  ;;  %s1693_s11 = sld [smem:[#allocation46_spill]]  ;;  %p25_p4 = scmp.ge.s32.totalorder %s1384_s9, 4  }
 0x1ad   : > { %s1694_s26 = sld [smem:[#allocation47_spill]]  ;;  %s1695_s24 = smov %s1232_s25 }
 0x1ae   : > { %s1697_s27 = smov %s1384_s9  ;;  %27 = sbr.rel (!%p25_p4) target bundleno = 16 (0x10), region = 154 }
 0x1b2   : > { %s1696_s25 = smov %s1693_s11 }
 0x1b3   :  { %550 = vsyncpa [#allocation7], 1 }
 0x1b4   :  { %552 = vsyncpa [#allocation7 + $0x1], 1 }
 0x1b5   :  { %553 = vsyncpa [#allocation10], 1 }
 0x1b6   :  { %554 = vsyncpa [#allocation13], 1 }
 0x1b7   :  { %555 = vsyncpa [#allocation8], 1 }
 0x1b8   :  { %557 = vsyncpa [#allocation8 + $0x1], 1 }
 0x1b9   :  { %558 = vsyncmov [#allocation3] }
 0x1bc   :  { %s559_s27 = vpop.sfrf %558 }
 0x1bd   :  { %p730_p11 = scmp.ne.s32.totalorder %s559_s27, 0 }
 0x1bf   :  { %563 = shalt.err (%p730_p11)  }
 0x1c0   :  { %565 = vsyncmov [#allocation3 + $0x1] }
 0x1c3   :  { %s566_s30 = vpop.sfrf %565 }
 0x1c4   :  { %p731_p6 = scmp.ne.s32.totalorder %s566_s30, 0 }
 0x1c6   :  { %570 = shalt.err (%p731_p6)  }
 0x1c7   :  { %572 = vsyncmov [#allocation3 + $0x2] }
 0x1ca   :  { %s573_s13 = vpop.sfrf %572 }
 0x1cb   :  { %p732_p12 = scmp.ne.s32.totalorder %s573_s13, 0 }
 0x1cd   :  { %577 = shalt.err (%p732_p12)  }
 0x1ce   :  { %579 = vsyncmov [#allocation3 + $0x3] }
 0x1d1   :  { %s580_s9 = vpop.sfrf %579 }
 0x1d2   :  { %p733_p5 = scmp.ne.s32.totalorder %s580_s9, 0 }
 0x1d4   :  { %584 = shalt.err (%p733_p5)  }
 0x1d5   :  { %586 = vsyncmov [#allocation3 + $0x4] }
 0x1d8   :  { %s587_s2 = vpop.sfrf %586 }
 0x1d9   :  { %p734_p7 = scmp.ne.s32.totalorder %s587_s2, 0 }
 0x1db   :  { %591 = shalt.err (%p734_p7)  }
 0x1dc   :  { %593 = vsyncmov [#allocation3 + $0x5] }
 0x1df   :  { %s594_s6 = vpop.sfrf %593 }
 0x1e0   :  { %p735_p13 = scmp.ne.s32.totalorder %s594_s6, 0 }
 0x1e2   :  { %598 = shalt.err (%p735_p13)  }
 0x1e3   :  { %600 = vsyncmov [#allocation3 + $0x6] }
 0x1e6   :  { %s601_s24 = vpop.sfrf %600 }
 0x1e7   :  { %p736_p9 = scmp.ne.s32.totalorder %s601_s24, 0 }
 0x1e9   :  { %605 = shalt.err (%p736_p9)  }
 0x1ea   :  { %607 = vsyncmov [#allocation3 + $0x7] }
 0x1ed   :  { %s608_s25 = vpop.sfrf %607 }
 0x1ee   :  { %p737_p8 = scmp.ne.s32.totalorder %s608_s25, 0 }
 0x1f0   :  { %612 = shalt.err (%p737_p8)  }

</bundles_post_ra>
